<compile_context>
chip_gen: v6e
topology: v6e:2x2x1
jax: 0.10.0
libtpu: 0.0.40
codegen_flags: <defaults>
</compile_context>

<pallas_src>
import jax
import jax.numpy as jnp
from jax.experimental import pallas as pl
from jax.experimental.pallas import tpu as pltpu


def vi_kernel(x_ref, eps_ref, w1_ref, b1_ref, w2_ref, b2_ref, out_ref):
    """Fused VI forward for one batch tile (feature-major).

    x_ref  : (3, T)   inputs, batch on the lane axis
    eps_ref: (1, T)   uniform noise
    w1_ref : (32, 3)  fused first-layer weights [mu ; log_var] (transposed)
    b1_ref : (32, 1)  fused first-layer biases   (transposed)
    w2_ref : (32, 1)  fused second-layer weights [mu ; log_var]
    b2_ref : (2,)     SMEM scalars [b2_mu, b2_log_var]
    out_ref: (3, T)   rows = [z, mu, log_var]
    """
    x = x_ref[...]            # (3, T)
    w1 = w1_ref[...]          # (32, 3)
    b1 = b1_ref[...]          # (32, 1)

    # Layer 1: K=3 contraction as three broadcast multiply-adds on the VPU
    # (a (.,3) matmul would occupy <1% of the MXU and still pay push/pop latency).
    h = (b1
         + w1[:, 0:1] * x[0:1, :]
         + w1[:, 1:2] * x[1:2, :]
         + w1[:, 2:3] * x[2:3, :])          # (32, T)
    h = jnp.maximum(h, 0.0)                 # rows 0..15: mu branch, 16..31: log_var branch

    # Layer 2: one fused multiply + two 16-wide sublane reduces; scalar biases from SMEM.
    hw = h * w2_ref[...]                                                # (32, T)
    mu = jnp.sum(hw[:16, :], axis=0, keepdims=True) + b2_ref[0]         # (1, T)
    lv = jnp.sum(hw[16:, :], axis=0, keepdims=True) + b2_ref[1]         # (1, T)

    # Reparameterise (faithful to the reference: ADDS sigma and eps, eps ~ U[0,1)).
    sigma = jnp.exp(0.5 * lv) + 1e-05       # exp on the EUP
    z = mu + sigma + eps_ref[...]

    # Lane-dense direct row stores (no concat temporary).
    out_ref[0:1, :] = z
    out_ref[1:2, :] = mu
    out_ref[2:3, :] = lv


def _pick_tiling(n, tile_n):
    """Lane-align the batch axis and pick a tile size.

    Returns (n_pad, tile_n) with tile_n a multiple of 128 dividing n_pad.
    """
    # Round / guard the requested tile to a lane multiple; cap for v7x VMEM (64 MiB
    # physical): ~200 B of VMEM per lane element -> 64K lanes is a safe ceiling.
    tile_n = max(128, (int(tile_n) // 128) * 128)
    tile_n = min(tile_n, 64 * 1024)

    n_pad = pl.cdiv(n, 128) * 128
    if n_pad <= tile_n:
        # Whole batch fits in one tile; when possible split into two equal tiles so the
        # ("parallel",) batch axis can shard across v7x's two TensorCores (harmless on
        # the single-TC v5e/v6e).
        if n_pad >= 256 and (n_pad // 2) % 128 == 0:
            tile_n = n_pad // 2
        else:
            tile_n = n_pad
    else:
        n_pad = pl.cdiv(n_pad, tile_n) * tile_n

    assert tile_n % 128 == 0 and n_pad % tile_n == 0
    return n_pad, tile_n


def vi_forward(x, params, eps, *, tile_n=32 * 1024):
    """x: (N, 3) f32, eps: (N, 1) f32 -> (z, mu, log_var), each (N, 1) f32."""
    N = x.shape[0]
    n_pad, tile_n = _pick_tiling(N, tile_n)

    # Feature-major layout (batch on the 128-lane axis), zero-padded tail.
    x_t = jnp.zeros((3, n_pad), jnp.float32).at[:, :N].set(x.T.astype(jnp.float32))
    eps_t = jnp.zeros((1, n_pad), jnp.float32).at[:, :N].set(eps.T.astype(jnp.float32))

    # Fuse the two heads; transpose weights to feature-major.
    w1_t = jnp.concatenate([params["w1_mu"], params["w1_lv"]], axis=1).T   # (32, 3)
    b1_t = jnp.concatenate([params["b1_mu"], params["b1_lv"]], axis=1).T   # (32, 1)
    w2 = jnp.concatenate([params["w2_mu"], params["w2_lv"]], axis=0)       # (32, 1)
    b2 = jnp.stack([params["b2_mu"].reshape(()),
                    params["b2_lv"].reshape(())]).astype(jnp.float32)      # (2,)

    # VMEM budget: ~28 B/elem of double-buffered I/O + ~128 B/elem hidden + temps
    # => ~200 B per lane element; give generous headroom, stay under v7x's 64 MiB.
    vmem_bytes = int(min(60 * 1024 * 1024, 512 * tile_n + (2 << 20)))

    grid = (n_pad // tile_n,)
    out = pl.pallas_call(
        vi_kernel,
        out_shape=jax.ShapeDtypeStruct((3, n_pad), jnp.float32),
        grid=grid,
        in_specs=[
            pl.BlockSpec((3, tile_n), lambda i: (0, i)),    # x (feature-major)
            pl.BlockSpec((1, tile_n), lambda i: (0, i)),    # eps
            pl.BlockSpec((32, 3), lambda i: (0, 0)),        # fused W1^T (resident)
            pl.BlockSpec((32, 1), lambda i: (0, 0)),        # fused b1^T
            pl.BlockSpec((32, 1), lambda i: (0, 0)),        # fused w2 [mu ; log_var]
            pl.BlockSpec(memory_space=pltpu.MemorySpace.SMEM),  # b2 scalars
        ],
        out_specs=pl.BlockSpec((3, tile_n), lambda i: (0, i)),
        compiler_params=pltpu.CompilerParams(
            dimension_semantics=("parallel",),
            vmem_limit_bytes=vmem_bytes),
    )(x_t, eps_t, w1_t, b1_t, w2, b2)

    # Single fused un-pad + transpose; then cheap column views in PyTorch shape (N, 1).
    zmulv = out[:, :N].T                    # (N, 3) rows = [z | mu | log_var]
    z = zmulv[:, 0:1]
    mu = zmulv[:, 1:2]
    lv = zmulv[:, 2:3]
    return z, mu, lv


def vi_reference(x, params, eps):
    h_mu = jnp.maximum(x @ params["w1_mu"] + params["b1_mu"], 0.0)
    mu = h_mu @ params["w2_mu"] + params["b2_mu"]
    h_lv = jnp.maximum(x @ params["w1_lv"] + params["b1_lv"], 0.0)
    lv = h_lv @ params["w2_lv"] + params["b2_lv"]
    sigma = jnp.exp(0.5 * lv) + 1e-05
    return mu + sigma + eps, mu, lv


if __name__ == "__main__":
    key = jax.random.PRNGKey(0)
    ks = jax.random.split(key, 10)

    def init_u(k, shape, fan_in):
        # deterministic PyTorch-style uniform(-1/sqrt(fan_in), 1/sqrt(fan_in))
        bound = 1.0 / float(fan_in) ** 0.5
        return jax.random.uniform(k, shape, jnp.float32, -bound, bound)

    params = {
        "w1_mu": init_u(ks[0], (3, 16), 3),
        "b1_mu": init_u(ks[1], (1, 16), 3),
        "w2_mu": init_u(ks[2], (16, 1), 16),
        "b2_mu": init_u(ks[3], (1, 1), 16),
        "w1_lv": init_u(ks[4], (3, 16), 3),
        "b1_lv": init_u(ks[5], (1, 16), 3),
        "w2_lv": init_u(ks[6], (16, 1), 16),
        "b2_lv": init_u(ks[7], (1, 1), 16),
    }

    N = 256
    x = jax.random.normal(ks[8], (N, 3), jnp.float32)
    # torch.rand_like -> uniform [0, 1) noise; generated deterministically here and
    # passed into the kernel so z can be verified bit-for-bit against the reference.
    eps = jax.random.uniform(ks[9], (N, 1), jnp.float32)

    # With N=256 the tiler picks 2 lane-aligned tiles of 128 (exercises the grid and
    # the v7x two-TC split); large N uses 32K-lane tiles with an explicit VMEM budget.
    z, mu, lv = vi_forward(x, params, eps)
    jax.block_until_ready((z, mu, lv))

    z_ref, mu_ref, lv_ref = vi_reference(x, params, eps)
    assert z.shape == (N, 1) and mu.shape == (N, 1) and lv.shape == (N, 1)
    assert jnp.allclose(mu, mu_ref, atol=1e-5, rtol=1e-5), "mu mismatch"
    assert jnp.allclose(lv, lv_ref, atol=1e-5, rtol=1e-5), "log_var mismatch"
    assert jnp.allclose(z, z_ref, atol=1e-5, rtol=1e-5), "z mismatch"

    print("KERNEL_OK")
</pallas_src>

<mosaic_0001>
module attributes {stable_mosaic.version = 11 : i64} {
  func.func @vi_kernel(%arg0: i32, %arg1: memref<3x128xf32, #tpu.memory_space<vmem>>, %arg2: memref<1x128xf32, #tpu.memory_space<vmem>>, %arg3: memref<32x3xf32, #tpu.memory_space<vmem>>, %arg4: memref<32x1xf32, #tpu.memory_space<vmem>>, %arg5: memref<32x1xf32, #tpu.memory_space<vmem>>, %arg6: memref<2xf32, #tpu.memory_space<smem>>, %arg7: memref<3x128xf32, #tpu.memory_space<vmem>>) attributes {dimension_semantics = [#tpu.dimension_semantics<parallel>], iteration_bounds = array<i64: 2>, scalar_prefetch = 0 : i64, scratch_operands = 0 : i64, tpu.core_type = #tpu.core_type<tc>, window_params = [{transform_indices = @transform_0, window_bounds = array<i64: 3, 128>}, {transform_indices = @transform_1, window_bounds = array<i64: 1, 128>}, {pipeline_mode = #tpu.pipeline_mode<synchronous>, transform_indices = @transform_2, window_bounds = array<i64: 32, 3>}, {pipeline_mode = #tpu.pipeline_mode<synchronous>, transform_indices = @transform_3, window_bounds = array<i64: 32, 1>}, {pipeline_mode = #tpu.pipeline_mode<synchronous>, transform_indices = @transform_4, window_bounds = array<i64: 32, 1>}, {transform_indices = @transform_5, window_bounds = array<i64: 2>}, {transform_indices = @transform_6, window_bounds = array<i64: 3, 128>}]} {
    %c0 = arith.constant 0 : index
    %c0_0 = arith.constant 0 : index
    %0 = vector.load %arg1[%c0, %c0_0] : memref<3x128xf32, #tpu.memory_space<vmem>>, vector<3x128xf32>
    %c0_1 = arith.constant 0 : index
    %c0_2 = arith.constant 0 : index
    %1 = vector.load %arg3[%c0_1, %c0_2] : memref<32x3xf32, #tpu.memory_space<vmem>>, vector<32x3xf32>
    %c0_3 = arith.constant 0 : index
    %c0_4 = arith.constant 0 : index
    %2 = vector.load %arg4[%c0_3, %c0_4] : memref<32x1xf32, #tpu.memory_space<vmem>>, vector<32x1xf32>
    %3 = vector.extract_strided_slice %1 {offsets = [0, 0], sizes = [32, 1], strides = [1, 1]} : vector<32x3xf32> to vector<32x1xf32>
    %4 = vector.extract_strided_slice %0 {offsets = [0, 0], sizes = [1, 128], strides = [1, 1]} : vector<3x128xf32> to vector<1x128xf32>
    %5 = vector.broadcast %3 : vector<32x1xf32> to vector<32x128xf32>
    %6 = vector.broadcast %4 : vector<1x128xf32> to vector<32x128xf32>
    %7 = arith.mulf %5, %6 : vector<32x128xf32>
    %8 = vector.broadcast %2 : vector<32x1xf32> to vector<32x128xf32>
    %9 = arith.addf %8, %7 : vector<32x128xf32>
    %10 = vector.extract_strided_slice %1 {offsets = [0, 1], sizes = [32, 1], strides = [1, 1]} : vector<32x3xf32> to vector<32x1xf32>
    %11 = vector.extract_strided_slice %0 {offsets = [1, 0], sizes = [1, 128], strides = [1, 1]} : vector<3x128xf32> to vector<1x128xf32>
    %12 = vector.broadcast %10 : vector<32x1xf32> to vector<32x128xf32>
    %13 = vector.broadcast %11 : vector<1x128xf32> to vector<32x128xf32>
    %14 = arith.mulf %12, %13 : vector<32x128xf32>
    %15 = arith.addf %9, %14 : vector<32x128xf32>
    %16 = vector.extract_strided_slice %1 {offsets = [0, 2], sizes = [32, 1], strides = [1, 1]} : vector<32x3xf32> to vector<32x1xf32>
    %17 = vector.extract_strided_slice %0 {offsets = [2, 0], sizes = [1, 128], strides = [1, 1]} : vector<3x128xf32> to vector<1x128xf32>
    %18 = vector.broadcast %16 : vector<32x1xf32> to vector<32x128xf32>
    %19 = vector.broadcast %17 : vector<1x128xf32> to vector<32x128xf32>
    %20 = arith.mulf %18, %19 : vector<32x128xf32>
    %21 = arith.addf %15, %20 : vector<32x128xf32>
    %cst = arith.constant 0.000000e+00 : f32
    %22 = vector.broadcast %cst : f32 to vector<32x128xf32>
    %23 = arith.maximumf %21, %22 : vector<32x128xf32>
    %c0_5 = arith.constant 0 : index
    %c0_6 = arith.constant 0 : index
    %24 = vector.load %arg5[%c0_5, %c0_6] : memref<32x1xf32, #tpu.memory_space<vmem>>, vector<32x1xf32>
    %25 = vector.broadcast %24 : vector<32x1xf32> to vector<32x128xf32>
    %26 = arith.mulf %23, %25 : vector<32x128xf32>
    %27 = vector.extract_strided_slice %26 {offsets = [0, 0], sizes = [16, 128], strides = [1, 1]} : vector<32x128xf32> to vector<16x128xf32>
    %cst_7 = arith.constant dense<0.000000e+00> : vector<128xf32>
    %28 = vector.multi_reduction <add>, %27, %cst_7 [0] : vector<16x128xf32> to vector<128xf32>
    %29 = vector.shape_cast %28 : vector<128xf32> to vector<1x128xf32>
    %c0_8 = arith.constant 0 : index
    %30 = memref.load %arg6[%c0_8] : memref<2xf32, #tpu.memory_space<smem>>
    %31 = vector.broadcast %30 : f32 to vector<1x128xf32>
    %32 = arith.addf %29, %31 : vector<1x128xf32>
    %33 = vector.extract_strided_slice %26 {offsets = [16, 0], sizes = [16, 128], strides = [1, 1]} : vector<32x128xf32> to vector<16x128xf32>
    %cst_9 = arith.constant dense<0.000000e+00> : vector<128xf32>
    %34 = vector.multi_reduction <add>, %33, %cst_9 [0] : vector<16x128xf32> to vector<128xf32>
    %35 = vector.shape_cast %34 : vector<128xf32> to vector<1x128xf32>
    %c1 = arith.constant 1 : index
    %36 = memref.load %arg6[%c1] : memref<2xf32, #tpu.memory_space<smem>>
    %37 = vector.broadcast %36 : f32 to vector<1x128xf32>
    %38 = arith.addf %35, %37 : vector<1x128xf32>
    %cst_10 = arith.constant 5.000000e-01 : f32
    %39 = vector.broadcast %cst_10 : f32 to vector<1x128xf32>
    %40 = arith.mulf %39, %38 : vector<1x128xf32>
    %41 = math.exp %40 : vector<1x128xf32>
    %cst_11 = arith.constant 9.99999974E-6 : f32
    %42 = vector.broadcast %cst_11 : f32 to vector<1x128xf32>
    %43 = arith.addf %41, %42 : vector<1x128xf32>
    %44 = arith.addf %32, %43 : vector<1x128xf32>
    %c0_12 = arith.constant 0 : index
    %c0_13 = arith.constant 0 : index
    %45 = vector.load %arg2[%c0_12, %c0_13] : memref<1x128xf32, #tpu.memory_space<vmem>>, vector<1x128xf32>
    %46 = arith.addf %44, %45 : vector<1x128xf32>
    %c0_14 = arith.constant 0 : index
    %c0_15 = arith.constant 0 : index
    %47 = vector.load %arg7[%c0_14, %c0_15] : memref<3x128xf32, #tpu.memory_space<vmem>>, vector<1x128xf32>
    tpu.vector_store %arg7[%c0_14, %c0_15], %46 {strides = array<i32>} : memref<3x128xf32, #tpu.memory_space<vmem>>, vector<1x128xf32>,
    %c1_16 = arith.constant 1 : index
    %c0_17 = arith.constant 0 : index
    %48 = vector.load %arg7[%c1_16, %c0_17] : memref<3x128xf32, #tpu.memory_space<vmem>>, vector<1x128xf32>
    tpu.vector_store %arg7[%c1_16, %c0_17], %32 {strides = array<i32>} : memref<3x128xf32, #tpu.memory_space<vmem>>, vector<1x128xf32>,
    %c2 = arith.constant 2 : index
    %c0_18 = arith.constant 0 : index
    %49 = vector.load %arg7[%c2, %c0_18] : memref<3x128xf32, #tpu.memory_space<vmem>>, vector<1x128xf32>
    tpu.vector_store %arg7[%c2, %c0_18], %38 {strides = array<i32>} : memref<3x128xf32, #tpu.memory_space<vmem>>, vector<1x128xf32>,
    return
  }
  func.func @transform_0(%arg0: i32) -> (i32, i32) {
    %c0_i32 = arith.constant 0 : i32
    %c0_i32_0 = arith.constant 0 : i32
    return %c0_i32, %arg0 : i32, i32
  }
  func.func @transform_1(%arg0: i32) -> (i32, i32) {
    %c0_i32 = arith.constant 0 : i32
    %c0_i32_0 = arith.constant 0 : i32
    return %c0_i32, %arg0 : i32, i32
  }
  func.func @transform_2(%arg0: i32) -> (i32, i32) {
    %c0_i32 = arith.constant 0 : i32
    %c0_i32_0 = arith.constant 0 : i32
    %c0_i32_1 = arith.constant 0 : i32
    return %c0_i32, %c0_i32_0 : i32, i32
  }
  func.func @transform_3(%arg0: i32) -> (i32, i32) {
    %c0_i32 = arith.constant 0 : i32
    %c0_i32_0 = arith.constant 0 : i32
    %c0_i32_1 = arith.constant 0 : i32
    return %c0_i32, %c0_i32_0 : i32, i32
  }
  func.func @transform_4(%arg0: i32) -> (i32, i32) {
    %c0_i32 = arith.constant 0 : i32
    %c0_i32_0 = arith.constant 0 : i32
    %c0_i32_1 = arith.constant 0 : i32
    return %c0_i32, %c0_i32_0 : i32, i32
  }
  func.func @transform_5(%arg0: i32) -> i32 {
    %c0_i32 = arith.constant 0 : i32
    %c0_i32_0 = arith.constant 0 : i32
    return %c0_i32 : i32
  }
  func.func @transform_6(%arg0: i32) -> (i32, i32) {
    %c0_i32 = arith.constant 0 : i32
    %c0_i32_0 = arith.constant 0 : i32
    return %c0_i32, %arg0 : i32, i32
  }
}

</mosaic_0001>

<bundles_post_ra>
// kernel: tpu_custom_call.1
= control target key start
LH: loop header
LB: loop body
LE: loop exit
PB: predicated region body
PF: predicated region fallthrough
CT: control target
= control target key end

     0   :  { %11 = vsyncpa [#allocation4], 0  ;;  %s908_s0 = inlined_call_operand.vmem [shape: f32[3,256], index: 0, kind: input, shape index: {}]   ;;  %s909_s1 = inlined_call_operand.vmem [shape: f32[1,256], index: 1, kind: input, shape index: {}]   ;;  %s910_s2 = inlined_call_operand.vmem [shape: f32[32,3], index: 2, kind: input, shape index: {}]   ;;  %s911_s3 = inlined_call_operand.vmem [shape: f32[32,1], index: 3, kind: input, shape index: {}]   ;;  %s912_s4 = inlined_call_operand.vmem [shape: f32[32,1], index: 4, kind: input, shape index: {}]   ;;  %s913_s5 = inlined_call_operand.vmem [shape: f32[2], index: 5, kind: input, shape index: {}]   ;;  %s914_s6 = inlined_call_operand.hbm [shape: f32[3,256], index: 6, kind: output, shape index: {}]  }
   0x1   :  { %12 = vsyncpa [#allocation3], 0 }
   0x2   :  { %14 = vsyncpa [#allocation3 + $0x1], 0  ;;  %s750_s21 = smov 0   ;;  %s752_s22 = smov 0  }
   0x3   :  { %s754_s23 = smov 0   ;;  %s756_s24 = smov 0  }
   0x4 LB: > { %s771_s25 = sadd.s32 4294967295, %s708_s24   ;;  %s548_s26 = sadd.s32 4294967294, %s708_s24   ;;  %s708_s24 = sphi %s756_s24, %s921_s24   ;;  %s704_s23 = sphi %s754_s23, %s920_s23   ;;  %s700_s22 = sphi %s752_s22, %s919_s22   ;;  %s696_s21 = sphi %s750_s21, %s918_s21  }
   0x5   : > { %s775_s27 = sadd.s32 1, %s708_s24   ;;  %s163_s28 = sadd.s32 1, %s704_s23 }
   0x6   : > { %s160_s29 = ssub.s32 %s708_s24, %s775_s27  ;;  %p173_p0 = scmp.ne.s32.totalorder %s704_s23, %s700_s22 }
   0x7   : > { %p161_p1 = scmp.eq.s32.totalorder %s160_s29, 0  ;;  %p174_p2 = scmp.eq.s32.totalorder %s771_s25, 1 }
   0x8   : > { %p179_p3 = scmp.ne.s32.totalorder %s700_s22, %s696_s21  ;;  %p180_p4 = scmp.eq.s32.totalorder %s548_s26, 1 }
   0x9   : > { %s786_s30 = scalar_select %p161_p1, %s704_s23, %s163_s28  }
   0xa   : > { %p788_p5 = por %p174_p2, %p173_p0  ;;  %p792_p6 = por %p180_p4, %p179_p3 }
   0xb   : > { %p549_p7 = scmp.ge.s32.totalorder %s708_s24, 1  ;;  %p187_p8 = scmp.lt.s32.totalorder %s708_s24, 3 }
   0xc   : > { %p575_p9 = scmp.eq.s32.totalorder %s771_s25, 0  ;;  %s209_s12 = sshll.u32 %s913_s5, 4  ;;  %s210_s12 = int_to_ptr.vmem [resolvable:$true] %s209_s12 }
   0xd   : > { %p799_p10 = pnand %p549_p7, %p187_p8  ;;  %s629_s13 = scalar_lea.vmem %s210_s12, 16 }
   0xe   : > { %p630_p13 = scmp.ne.s32.totalorder %s210_s12, %s629_s13  ;;  %p637_p3 = scmp.lt.s32.totalorder %s210_s12, %s210_s12 }
   0xf   : > { %p567_p11 = pneg %p799_p10  ;;  %p638_p4 = scmp.lt.s32.totalorder %s629_s13, %s629_s13 }
  0x11   : > { %p568_p12 = pnand %p575_p9, %p567_p11  ;;  %p639_p7 = por %p638_p4, %p637_p3 }
  0x13   : > { %p631_p0 = pneg %p568_p12 }
  0x15   : > { %p632_p1 = pnand %p631_p0, %p630_p13 }
  0x17   : > { %p633_p2 = pneg %p632_p1 }
  0x19   : > { %p640_p8 = pnand %p639_p7, %p633_p2 }
  0x1b   : > { %643 = shalt.err (!%p640_p8)
}
  0x1c   : > { %s710_s14 = smov [#allocation2]   ;;  %235 = sbr.rel (%p799_p10) target bundleno = 248 (0xf8), region = 44 }
  0x1d   : > { %570 = dma.vmem_to_smem (!%p568_p12), %s210_s12, 16, %s710_s14, [#allocation4]  }
  0x21   : > { %687 = dma.done.wait (%p575_p9), [#allocation4], 16  }
  0x22   : > { %689 = vsyncadd (%p575_p9), [#allocation4], 4294967280 }
  0x23   : > { %241 = sfence }
  0x24   : > { %v282_v0 = vld [vmem:[%s911_s3 + $0x10] sm:$0xff]  ;;  %v711_v2 = vmov 0   ;;  %v283_v3 = vld [vmem:[%s911_s3 + $0x18] sm:$0xff]  ;;  %v712_v5 = vmov 1   ;;  %v713_v6 = vmov 2   ;;  %v276_v8 = vld [vmem:[%s910_s2] sm:$0xff]  ;;  %v304_v15 = vlaneseq }
  0x25   : > { %v278_v1 = vld [vmem:[%s910_s2 + $0x10] sm:$0xff]  ;;  %615 = vset.pattern.permute.xlu1 %v711_v2  ;;  %614 = vset.pattern.permute.xlu0 %v711_v2  ;;  %v279_v4 = vld [vmem:[%s910_s2 + $0x18] sm:$0xff]  ;;  %v281_v10 = vld [vmem:[%s911_s3 + $0x8] sm:$0xff]  ;;  %p268_p9 = scmp.lt.s32.totalorder %s771_s25, 1  ;;  %s556_s14 = sld [smem:[#allocation2 + $0x1]] }
  0x26   : > { %324 = vperm.xlu1 %615, %v282_v0   ;;  %296 = vperm.xlu0 %614, %v278_v1   ;;  %v398_v7 = vld [vmem:[%s912_s4 + $0x10] sm:$0xff]  ;;  %v399_v9 = vld [vmem:[%s912_s4 + $0x18] sm:$0xff]  ;;  %v277_v11 = vld [vmem:[%s910_s2 + $0x8] sm:$0xff]  ;;  %v305_v16 = vshrl.u32 %v304_v15, 7  ;;  %s265_s15 = sand.u32 1, %s700_s22   ;;  %s431_s18 = sld [smem:[#allocation2]] }
  0x27   : > { %v280_v12 = vld [vmem:[%s911_s3] sm:$0xff]  ;;  %v397_v14 = vld [vmem:[%s912_s4 + $0x8] sm:$0xff]  ;;  %s854_s9 = scalar_select %p268_p9, %s771_s25, 1 }
  0x28   : > { %v396_v13 = vld [vmem:[%s912_s4] sm:$0xff]  ;;  %v306_v19 = vsub.s32 0, %v305_v16  ;;  %v354_v21 = vsub.s32 1, %v305_v16  ;;  %v382_v26 = vsub.s32 2, %v305_v16  ;;  %s554_s16 = sshll.u32 %s265_s15, 2  ;;  %s558_s28 = sshll.u32 %s771_s25, 6 }
  0x29   : > { %s555_s10 = sshll.u32 %s854_s9, 2  ;;  %s863_s17 = scalar_lea.vmem [#allocation5], %s554_s16 }
  0x2a   : > { %329 = vperm.xlu1 %615, %v283_v3   ;;  %301 = vperm.xlu0 %614, %v279_v4   ;;  %s271_s13 = scalar_lea.vmem %s908_s0, %s555_s10  ;;  %s274_s26 = scalar_lea.vmem %s909_s1, %s854_s9 }
  0x2b   : > { %v275_v20 = vld [vmem:[%s271_s13] sm:$0x7]  ;;  %v442_v62 = vstv %s556_s14  ;;  %s468_s29 = sshll.u32 %s863_s17, 4  ;;  %s466_s12 = scalar_lea.hbm %s914_s6, %s558_s28  ;;  %s469_s29 = int_to_ptr.vmem [resolvable:$true] %s468_s29 }
  0x2c   : > { %v307_v24 = vrot.slane %v275_v20, %v306_v19  ;;  %v355_v25 = vrot.slane %v275_v20, %v354_v21  ;;  %v383_v32 = vrot.slane %v275_v20, %v382_v26  ;;  %s455_s13 = scalar_lea.sflag [#allocation3], %s265_s15  ;;  %s644_s14 = scalar_lea.vmem %s469_s29, 64 }
  0x2d   : > { %p645_p10 = scmp.ne.s32.totalorder %s469_s29, %s644_s14  ;;  %s714_s9 = smov [#allocation5]  }
  0x2e   : > { %617 = vset.pattern.permute.xlu1 %v712_v5  ;;  %616 = vset.pattern.permute.xlu0 %v712_v5  ;;  %s648_s16 = sshll.u32 %s714_s9, 4  ;;  %s649_s16 = int_to_ptr.vmem [resolvable:$false] %s648_s16 }
  0x2f   : > { %349 = vperm.xlu1 %617, %v279_v4   ;;  %345 = vperm.xlu0 %616, %v278_v1   ;;  %p646_p11 = pnand %p645_p10, %p788_p5  ;;  %s650_s25 = scalar_lea.vmem %s649_s16, 128 }
  0x30   : > { %p651_p13 = scmp.lt.s32.totalorder %s469_s29, %s649_s16  ;;  %p652_p0 = scmp.lt.s32.totalorder %s650_s25, %s644_s14 }
  0x31   : > { %p647_p12 = pneg %p646_p11 }
  0x32   : > { %p653_p1 = por %p652_p0, %p651_p13 }
  0x33   : > { %618 = vset.pattern.permute.xlu1 %v713_v6  ;;  %619 = vset.pattern.permute.xlu0 %v713_v6 }
  0x34   : > { %373 = vperm.xlu1 %618, %v278_v1   ;;  %377 = vperm.xlu0 %619, %v279_v4   ;;  %p654_p2 = pnand %p653_p1, %p647_p12 }
  0x38   : > { %620 = vset.pattern.permute.xlu1 %v711_v2  ;;  %621 = vset.pattern.permute.xlu0 %v711_v2 }
  0x39   : > { %412 = vperm.xlu1 %620, %v398_v7   ;;  %286 = vperm.xlu0 %621, %v276_v8  }
  0x3d   : > { %417 = vperm.xlu1 %620, %v399_v9   ;;  %319 = vperm.xlu0 %621, %v281_v10  }
  0x41   : > { %291 = vperm.xlu1 %620, %v277_v11   ;;  %623 = vset.pattern.permute.xlu0 %v712_v5 }
  0x42   : > { %341 = vperm.xlu0 %623, %v277_v11  }
  0x45   : > { %314 = vperm.xlu1 %620, %v280_v12  }
  0x46   : > { %625 = vset.pattern.permute.xlu0 %v711_v2 }
  0x47   : > { %402 = vperm.xlu0 %625, %v396_v13  }
  0x49   : > { %622 = vset.pattern.permute.xlu1 %v712_v5 }
  0x4a   : > { %337 = vperm.xlu1 %622, %v276_v8  }
  0x4e   : > { %624 = vset.pattern.permute.xlu1 %v713_v6 }
  0x4f   : > { %365 = vperm.xlu1 %624, %v276_v8  }
  0x53   : > { %369 = vperm.xlu1 %624, %v277_v11  }
  0x57   : > { %626 = vset.pattern.permute.xlu1 %v711_v2 }
  0x58   : > { %407 = vperm.xlu1 %626, %v397_v14  }
  0xa1   : > { %v325_v17 = vpop.permute.xlu1 %324  ;;  %v297_v18 = vpop.permute.xlu0 %296 }
  0xa2   : > { %v310_v27 = vmul.f32 %v307_v24, %v297_v18 }
  0xa4   : > { %v334_v34 = vadd.f32 %v325_v17, %v310_v27 }
  0xa5   : > { %v330_v22 = vpop.permute.xlu1 %329  ;;  %v302_v23 = vpop.permute.xlu0 %301 }
  0xa6   : > { %v311_v30 = vmul.f32 %v307_v24, %v302_v23 }
  0xa8   : > { %v335_v35 = vadd.f32 %v330_v22, %v311_v30  ;;  %v432_v30 = vstv %s431_s18 }
  0xaa   : > { %v350_v28 = vpop.permute.xlu1 %349  ;;  %v346_v29 = vpop.permute.xlu0 %345 }
  0xab   : > { %v358_v31 = vmul.f32 %v355_v25, %v346_v29  ;;  %v359_v33 = vmul.f32 %v355_v25, %v350_v28 }
  0xad   : > { %v362_v38 = vadd.f32 %v358_v31, %v334_v34  ;;  %v363_v41 = vadd.f32 %v359_v33, %v335_v35  ;;  %v449_v34 = vld [vmem:[%s274_s26] sm:$0x1] }
  0xaf   : > { %v374_v36 = vpop.permute.xlu1 %373  ;;  %v378_v37 = vpop.permute.xlu0 %377 }
  0xb0   : > { %v386_v39 = vmul.f32 %v383_v32, %v374_v36  ;;  %v387_v40 = vmul.f32 %v383_v32, %v378_v37 }
  0xb2   : > { %v390_v42 = vadd.f32 %v386_v39, %v362_v38  ;;  %v391_v43 = vadd.f32 %v387_v40, %v363_v41 }
  0xb4   : > { %v413_v44 = vpop.permute.xlu1 %412  ;;  %v394_v45 = vmax.f32 %v390_v42, 0.0  ;;  %v395_v46 = vmax.f32 %v391_v43, 0.0  ;;  %v287_v51 = vpop.permute.xlu0 %286 }
  0xb5   : > { %v308_v59 = vmul.f32 %v307_v24, %v287_v51 }
  0xb6   : > { %v422_v48 = vmul.f32 %v413_v44, %v394_v45 }
  0xb8   : > { %v418_v47 = vpop.permute.xlu1 %417  ;;  %v320_v57 = vpop.permute.xlu0 %319 }
  0xb9   : > { %v423_v49 = vmul.f32 %v418_v47, %v395_v46 }
  0xbb   : > { %v434_v50 = vadd.f32 %v423_v49, %v422_v48 }
  0xbc   : > { %v292_v52 = vpop.permute.xlu1 %291 }
  0xbd   : > { %v435_v53 = vrot.slane %v434_v50, 4  ;;  %v309_v0 = vmul.f32 %v307_v24, %v292_v52  ;;  %v342_v2 = vpop.permute.xlu0 %341 }
  0xbe   : > { %v357_v7 = vmul.f32 %v355_v25, %v342_v2 }
  0xbf   : > { %v436_v54 = vadd.f32 %v435_v53, %v434_v50  ;;  %v333_v6 = vadd.f32 %v320_v57, %v309_v0 }
  0xc0   : > { %v315_v55 = vpop.permute.xlu1 %314 }
  0xc1   : > { %v437_v56 = vrot.slane %v436_v54, 2  ;;  %v332_v3 = vadd.f32 %v315_v55, %v308_v59  ;;  %v361_v13 = vadd.f32 %v357_v7, %v333_v6 }
  0xc2   : > { %v403_v18 = vpop.permute.xlu0 %402 }
  0xc3   : > { %v438_v58 = vadd.f32 %v437_v56, %v436_v54 }
  0xc5   : > { %v439_v60 = vrot.slane %v438_v58, 1  ;;  %v338_v61 = vpop.permute.xlu1 %337 }
  0xc6   : > { %v356_v1 = vmul.f32 %v355_v25, %v338_v61 }
  0xc7   : > { %v440_v63 = vadd.f32 %v439_v60, %v438_v58 }
  0xc8   : > { %v360_v8 = vadd.f32 %v356_v1, %v332_v3 }
  0xc9   : > { %v443_v4 = vadd.f32 %v442_v62, %v440_v63 }
  0xca   : > { %v366_v5 = vpop.permute.xlu1 %365 }
  0xcb   : > { %v384_v9 = vmul.f32 %v383_v32, %v366_v5  ;;  %453 = vst [vmem:[%s863_s17 + $0x2] sm:$0x1] %v443_v4  ;;  %v444_v11 = vmul.f32 0.5, %v443_v4 }
  0xcd   : > { %v388_v10 = vadd.f32 %v384_v9, %v360_v8  ;;  %v445_v17 = vmul.f32 1.442695, %v444_v11 }
  0xce   : > { %v370_v12 = vpop.permute.xlu1 %369 }
  0xcf   : > { %v385_v14 = vmul.f32 %v383_v32, %v370_v12  ;;  %v392_v16 = vmax.f32 %v388_v10, 0.0  ;;  %627 = vpow2.f32 %v445_v17 }
  0xd1   : > { %v389_v15 = vadd.f32 %v385_v14, %v361_v13  ;;  %v420_v21 = vmul.f32 %v403_v18, %v392_v16 }
  0xd3   : > { %v408_v19 = vpop.permute.xlu1 %407  ;;  %v393_v20 = vmax.f32 %v389_v15, 0.0 }
  0xd5   : > { %v421_v22 = vmul.f32 %v408_v19, %v393_v20 }
  0xd7   : > { %v424_v23 = vadd.f32 %v421_v22, %v420_v21 }
  0xd9   : > { %v425_v24 = vrot.slane %v424_v23, 4 }
  0xdb   : > { %v426_v25 = vadd.f32 %v425_v24, %v424_v23 }
  0xdc   : > { %v628_v29 = vpop.eup %627 }
  0xdd   : > { %v427_v26 = vrot.slane %v426_v25, 2  ;;  %v447_v33 = vadd.f32 1e-05, %v628_v29 }
  0xdf   : > { %v428_v27 = vadd.f32 %v427_v26, %v426_v25 }
  0xe1   : > { %v429_v28 = vrot.slane %v428_v27, 1 }
  0xe3   : > { %v430_v31 = vadd.f32 %v429_v28, %v428_v27 }
  0xe5   : > { %v433_v32 = vadd.f32 %v432_v30, %v430_v31 }
  0xe7   : > { %v448_v35 = vadd.f32 %v447_v33, %v433_v32  ;;  %452 = vst [vmem:[%s863_s17 + $0x1] sm:$0x1] %v433_v32 }
  0xe9   : > { %v450_v36 = vadd.f32 %v449_v34, %v448_v35 }
  0xeb   : > { %451 = vst [vmem:[%s863_s17] sm:$0x1] %v450_v36 }
  0xec   : > { %657 = shalt.err (!%p654_p2)
}
  0xed   : > { %s658_s18 = scalar_lea.hbm %s466_s12, 64  ;;  %s662_s19 = scalar_lea.hbm %s914_s6, 128 }
  0xee   : > { %p659_p3 = scmp.ne.s32.totalorder %s466_s12, %s658_s18  ;;  %p663_p8 = scmp.lt.s32.totalorder %s466_s12, %s914_s6 }
  0xef   : > { %p664_p9 = scmp.lt.s32.totalorder %s662_s19, %s658_s18 }
  0xf0   : > { %p660_p4 = pnand %p659_p3, %p788_p5 }
  0xf1   : > { %p665_p10 = por %p664_p9, %p663_p8 }
  0xf2   : > { %p661_p7 = pneg %p660_p4 }
  0xf4   : > { %p666_p11 = pnand %p665_p10, %p661_p7 }
  0xf6   : > { %669 = shalt.err (!%p666_p11)
}
  0xf7   : > { %565 = dma.vmem_to_hbm [thread:$0]  (%p788_p5), %s469_s29, 64, %s466_s12, %s455_s13  }
  0xf8 PF: > { %p577_p12 = scmp.ge.s32.totalorder %s708_s24, 2  ;;  %s480_s28 = sand.u32 1, %s696_s21  }
  0xf9   : > { %s481_s10 = scalar_lea.sflag [#allocation3], %s480_s28 }
  0xfa   : > { %p572_p13 = pnand %p577_p12, %p792_p6 }
  0xfc   : > { %p573_p0 = pneg %p572_p13 }
  0xfe   : > { %691 = dma.done.wait (%p573_p0), %s481_s10, 64  }
  0xff   : > { %693 = vsyncadd (%p573_p0), %s481_s10, 4294967232  ;;  %p17_p1 = scmp.ge.s32.totalorder %s775_s27, 4   ;;  %s918_s21 = smov %s700_s22 }
 0x100   : > { %s919_s22 = smov %s704_s23  ;;  %s920_s23 = smov %s786_s30 }
 0x101   : > { %s921_s24 = smov %s775_s27  ;;  %19 = sbr.rel (!%p17_p1) target bundleno = 4 (0x4), region = 87 }
 0x106   :  { %486 = vsyncpa [#allocation3], 1 }
 0x107   :  { %488 = vsyncpa [#allocation3 + $0x1], 1 }
 0x108   :  { %489 = vsyncpa [#allocation4], 1 }
 0x109   :  { %491 = vsyncpa [#allocation4 + $0x1], 1 }

</bundles_post_ra>
